<compile_context>
chip_gen: v7x
topology: tpu7x:2x2x1
jax: 0.10.0
libtpu: 0.0.40
codegen_flags: <defaults>
</compile_context>

<pallas_src>
import jax
import jax.numpy as jnp
from jax.experimental import pallas as pl
from jax.experimental.pallas import tpu as pltpu

# ---------------- problem sizes (small, consistent with the module) -----------
N_BATCH = 2        # N
SEQ_T   = 8        # T
E_IN    = 32       # n_input
E_OUT   = 32       # n_output (d_model)
N_HEAD  = 4
HEAD_D  = E_OUT // N_HEAD
D_FF    = 512
LN_EPS  = 1e-5

# row indices of the packed bias / LayerNorm vector slab (shape (8, 3E))
(_ROW_PROJ_B, _ROW_OUT_B, _ROW_LN1W, _ROW_LN1B,
 _ROW_FF2B, _ROW_LN2W, _ROW_LN2B, _ROW_QKVB) = range(8)


def _layer_norm(x, w, b):
    # torch.nn.LayerNorm over last dim, biased variance, eps=1e-5.
    # One-pass variance: mean(x*x) - mu*mu (one cross-lane reduction saved).
    mu = jnp.mean(x, axis=-1, keepdims=True)
    var = jnp.mean(x * x, axis=-1, keepdims=True) - mu * mu
    return (x - mu) * jax.lax.rsqrt(var + LN_EPS) * w + b


def attention_block_kernel(
    x_ref,                 # (N*T, E_in) f32   folded batch*seq slab
    wpo_ref,               # (2E, E)    f32    rows 0:E = proj_w.T, rows E:2E = out_w.T
    wqkv_ref,              # (E, 3E)    f32    fused qkv weight, 1/sqrt(Dh) folded into q cols
    vecs_ref,              # (8, 3E)    f32    packed bias / LN vectors (row layout above)
    ff1b_ref,              # (1, F)     f32
    ff1wt_ref,             # (E, F)     bf16   pre-transposed
    ff2wt_ref,             # (F, E)     bf16   pre-transposed
    o_ref,                 # (N*T, E)   f32
):
    E, T, N, H, Dh = E_OUT, SEQ_T, N_BATCH, N_HEAD, HEAD_D

    xs = x_ref[...]
    wpo = wpo_ref[...]
    proj_wt, out_wt = wpo[0:E, :], wpo[E:2 * E, :]

    vecs = vecs_ref[...]
    proj_b = vecs[_ROW_PROJ_B:_ROW_PROJ_B + 1, 0:E]
    out_b  = vecs[_ROW_OUT_B:_ROW_OUT_B + 1, 0:E]
    ln1_w  = vecs[_ROW_LN1W:_ROW_LN1W + 1, 0:E]
    ln1_b  = vecs[_ROW_LN1B:_ROW_LN1B + 1, 0:E]
    ff2_b  = vecs[_ROW_FF2B:_ROW_FF2B + 1, 0:E]
    ln2_w  = vecs[_ROW_LN2W:_ROW_LN2W + 1, 0:E]
    ln2_b  = vecs[_ROW_LN2B:_ROW_LN2B + 1, 0:E]
    qkv_b  = vecs[_ROW_QKVB:_ROW_QKVB + 1, 0:3 * E]

    # --- input projection (self.proj), full slab, one GEMM ---
    h = jnp.dot(xs, proj_wt, preferred_element_type=jnp.float32) + proj_b        # (N*T, E)

    # --- fused q/k/v projection, ONE GEMM on the full slab ---
    qkv = jnp.dot(h, wqkv_ref[...], preferred_element_type=jnp.float32) + qkv_b  # (N*T, 3E)

    # --- multi-head self attention: only scores/softmax/context stay per (batch, head) ---
    ctx_rows = []
    for n in range(N):
        r0 = n * T
        heads = []
        for hh in range(H):
            c0 = hh * Dh
            qn = qkv[r0:r0 + T, c0:c0 + Dh]                      # (T, Dh), scale pre-folded
            kn = qkv[r0:r0 + T, E + c0:E + c0 + Dh]
            vn = qkv[r0:r0 + T, 2 * E + c0:2 * E + c0 + Dh]
            # scores = qn @ kn.T (contract last dims; no explicit transpose)
            s = jax.lax.dot_general(qn, kn, (((1,), (1,)), ((), ())),
                                    preferred_element_type=jnp.float32)          # (T, T)
            s = s - jnp.max(s, axis=-1, keepdims=True)
            p = jnp.exp(s)
            p = p * pl.reciprocal(jnp.sum(p, axis=-1, keepdims=True), approx=True)
            heads.append(jnp.dot(p, vn, preferred_element_type=jnp.float32))     # (T, Dh)
        ctx_rows.append(jnp.concatenate(heads, axis=-1))         # (T, E)   lane concat
    ctx = jnp.concatenate(ctx_rows, axis=0)                      # (N*T, E) sublane concat

    # --- out_proj hoisted: ONE GEMM + single bias add ---
    attn = jnp.dot(ctx, out_wt, preferred_element_type=jnp.float32) + out_b

    # --- add & norm 1 (post-norm) ---
    h1 = _layer_norm(h + attn, ln1_w, ln1_b)

    # --- feed-forward (relu); bf16 MXU feeds, f32 accumulate & elementwise ---
    f = jnp.dot(h1.astype(jnp.bfloat16), ff1wt_ref[...],
                preferred_element_type=jnp.float32) + ff1b_ref[...]
    f = jnp.maximum(f, 0.0)
    f = jnp.dot(f.astype(jnp.bfloat16), ff2wt_ref[...],
                preferred_element_type=jnp.float32) + ff2_b

    # --- add & norm 2 ---
    h2 = _layer_norm(h1 + f, ln2_w, ln2_b)
    o_ref[...] = h2.astype(o_ref.dtype)


def attention_block(x, params):
    N, T, Ein = x.shape
    E, F, H, Dh = E_OUT, D_FF, N_HEAD, HEAD_D
    scale = 1.0 / (Dh ** 0.5)

    # ---- host-side weight plumbing: pre-transpose, fuse qkv, fold scale, pack DMAs ----
    in_w, in_b = params["in_w"], params["in_b"]                   # (3E, E), (1, 3E)
    scale_vec = jnp.concatenate(
        [jnp.full((E,), scale, jnp.float32), jnp.ones((2 * E,), jnp.float32)])
    wqkv = (in_w * scale_vec[:, None]).T                          # (E, 3E), q cols pre-scaled
    qkv_b = in_b * scale_vec[None, :]                             # (1, 3E)

    w_po = jnp.concatenate([params["proj_w"].T, params["out_w"].T], axis=0)   # (2E, E)

    vecs = jnp.zeros((8, 3 * E), jnp.float32)
    vecs = vecs.at[_ROW_PROJ_B, :E].set(params["proj_b"][0])
    vecs = vecs.at[_ROW_OUT_B, :E].set(params["out_b"][0])
    vecs = vecs.at[_ROW_LN1W, :E].set(params["ln1_w"][0])
    vecs = vecs.at[_ROW_LN1B, :E].set(params["ln1_b"][0])
    vecs = vecs.at[_ROW_FF2B, :E].set(params["ff2_b"][0])
    vecs = vecs.at[_ROW_LN2W, :E].set(params["ln2_w"][0])
    vecs = vecs.at[_ROW_LN2B, :E].set(params["ln2_b"][0])
    vecs = vecs.at[_ROW_QKVB, :].set(qkv_b[0])

    ff1_wt = params["ff1_w"].T.astype(jnp.bfloat16)               # (E, F)  bf16 (halves DMA)
    ff2_wt = params["ff2_w"].T.astype(jnp.bfloat16)               # (F, E)  bf16

    args = [
        x.reshape(N * T, Ein),
        w_po, wqkv, vecs, params["ff1_b"],
        ff1_wt, ff2_wt,
    ]

    # Single invocation, no grid: whole ~130 KB working set is VMEM-resident.
    vmem_spec = pl.BlockSpec(memory_space=pltpu.MemorySpace.VMEM)
    out = pl.pallas_call(
        attention_block_kernel,
        out_shape=jax.ShapeDtypeStruct((N * T, E), jnp.float32),
        in_specs=[vmem_spec] * len(args),
        out_specs=vmem_spec,
    )(*args)
    return out.reshape(N, T, E)


# ---------------- pure-JAX reference (same math, for a sanity check) ----------
def reference(x, p):
    h = x @ p["proj_w"].T + p["proj_b"]
    qkv = h @ p["in_w"].T + p["in_b"]
    q, k, v = jnp.split(qkv, 3, axis=-1)

    def split_heads(t):  # (N, T, E) -> (N, H, T, Dh)
        Nb, T, _ = t.shape
        return t.reshape(Nb, T, N_HEAD, HEAD_D).transpose(0, 2, 1, 3)

    qh, kh, vh = split_heads(q), split_heads(k), split_heads(v)
    scores = jnp.einsum("nhtd,nhsd->nhts", qh, kh) / (HEAD_D ** 0.5)
    probs = jax.nn.softmax(scores, axis=-1)
    ctx = jnp.einsum("nhts,nhsd->nhtd", probs, vh)
    ctx = ctx.transpose(0, 2, 1, 3).reshape(x.shape[0], x.shape[1], E_OUT)
    attn = ctx @ p["out_w"].T + p["out_b"]

    def ln(t, w, b):
        mu = jnp.mean(t, axis=-1, keepdims=True)
        var = jnp.mean((t - mu) ** 2, axis=-1, keepdims=True)
        return (t - mu) / jnp.sqrt(var + LN_EPS) * w + b

    h1 = ln(h + attn, p["ln1_w"], p["ln1_b"])
    f = jnp.maximum(h1 @ p["ff1_w"].T + p["ff1_b"], 0.0) @ p["ff2_w"].T + p["ff2_b"]
    return ln(h1 + f, p["ln2_w"], p["ln2_b"])


def make_params(key):
    names_shapes = [
        ("proj_w", (E_OUT, E_IN)), ("proj_b", (1, E_OUT)),
        ("in_w", (3 * E_OUT, E_OUT)), ("in_b", (1, 3 * E_OUT)),
        ("out_w", (E_OUT, E_OUT)), ("out_b", (1, E_OUT)),
        ("ln1_w", (1, E_OUT)), ("ln1_b", (1, E_OUT)),
        ("ff1_w", (D_FF, E_OUT)), ("ff1_b", (1, D_FF)),
        ("ff2_w", (E_OUT, D_FF)), ("ff2_b", (1, E_OUT)),
        ("ln2_w", (1, E_OUT)), ("ln2_b", (1, E_OUT)),
    ]
    params = {}
    keys = jax.random.split(key, len(names_shapes))
    for (name, shape), k in zip(names_shapes, keys):
        if name.startswith("ln") and name.endswith("_w"):
            params[name] = jnp.ones(shape, jnp.float32)
        elif name.endswith("_b"):
            params[name] = jnp.zeros(shape, jnp.float32) if name.startswith("ln") \
                else 0.01 * jax.random.normal(k, shape, jnp.float32)
        else:
            params[name] = 0.05 * jax.random.normal(k, shape, jnp.float32)
    return params


if __name__ == "__main__":
    key = jax.random.PRNGKey(0)
    kx, kp = jax.random.split(key)
    x = jax.random.normal(kx, (N_BATCH, SEQ_T, E_IN), jnp.float32)
    params = make_params(kp)

    out = jax.jit(attention_block)(x, params)
    out = jax.block_until_ready(out)

    ref = jax.block_until_ready(reference(x, params))
    assert out.shape == (N_BATCH, SEQ_T, E_OUT)
    assert bool(jnp.allclose(out, ref, atol=1e-2, rtol=1e-2)), "mismatch vs reference"

    print("KERNEL_OK")
</pallas_src>

<mosaic_0001>
module attributes {stable_mosaic.version = 11 : i64} {
  func.func @attention_block_kernel(%arg0: memref<16x32xf32, #tpu.memory_space<vmem>>, %arg1: memref<64x32xf32, #tpu.memory_space<vmem>>, %arg2: memref<32x96xf32, #tpu.memory_space<vmem>>, %arg3: memref<8x96xf32, #tpu.memory_space<vmem>>, %arg4: memref<1x512xf32, #tpu.memory_space<vmem>>, %arg5: memref<32x512xbf16, #tpu.memory_space<vmem>>, %arg6: memref<512x32xbf16, #tpu.memory_space<vmem>>, %arg7: memref<16x32xf32, #tpu.memory_space<vmem>>) attributes {dimension_semantics = [], scalar_prefetch = 0 : i64, scratch_operands = 0 : i64, tpu.core_type = #tpu.core_type<tc>} {
    %c0 = arith.constant 0 : index
    %c0_0 = arith.constant 0 : index
    %0 = vector.load %arg0[%c0, %c0_0] : memref<16x32xf32, #tpu.memory_space<vmem>>, vector<16x32xf32>
    %c0_1 = arith.constant 0 : index
    %c0_2 = arith.constant 0 : index
    %1 = vector.load %arg1[%c0_1, %c0_2] : memref<64x32xf32, #tpu.memory_space<vmem>>, vector<64x32xf32>
    %2 = vector.extract_strided_slice %1 {offsets = [0, 0], sizes = [32, 32], strides = [1, 1]} : vector<64x32xf32> to vector<32x32xf32>
    %3 = vector.extract_strided_slice %1 {offsets = [32, 0], sizes = [32, 32], strides = [1, 1]} : vector<64x32xf32> to vector<32x32xf32>
    %c0_3 = arith.constant 0 : index
    %c0_4 = arith.constant 0 : index
    %4 = vector.load %arg3[%c0_3, %c0_4] : memref<8x96xf32, #tpu.memory_space<vmem>>, vector<8x96xf32>
    %5 = vector.extract_strided_slice %4 {offsets = [0, 0], sizes = [1, 32], strides = [1, 1]} : vector<8x96xf32> to vector<1x32xf32>
    %6 = vector.extract_strided_slice %4 {offsets = [1, 0], sizes = [1, 32], strides = [1, 1]} : vector<8x96xf32> to vector<1x32xf32>
    %7 = vector.extract_strided_slice %4 {offsets = [2, 0], sizes = [1, 32], strides = [1, 1]} : vector<8x96xf32> to vector<1x32xf32>
    %8 = vector.extract_strided_slice %4 {offsets = [3, 0], sizes = [1, 32], strides = [1, 1]} : vector<8x96xf32> to vector<1x32xf32>
    %9 = vector.extract_strided_slice %4 {offsets = [4, 0], sizes = [1, 32], strides = [1, 1]} : vector<8x96xf32> to vector<1x32xf32>
    %10 = vector.extract_strided_slice %4 {offsets = [5, 0], sizes = [1, 32], strides = [1, 1]} : vector<8x96xf32> to vector<1x32xf32>
    %11 = vector.extract_strided_slice %4 {offsets = [6, 0], sizes = [1, 32], strides = [1, 1]} : vector<8x96xf32> to vector<1x32xf32>
    %12 = vector.extract_strided_slice %4 {offsets = [7, 0], sizes = [1, 96], strides = [1, 1]} : vector<8x96xf32> to vector<1x96xf32>
    %cst = arith.constant dense<0.000000e+00> : vector<16x32xf32>
    %13 = tpu.matmul %0, %2, %cst {dimension_numbers = #tpu.dot_dimension_numbers<[1], [0], [0], [1], [0, 0, 1, 1], [], []>} : vector<16x32xf32>, vector<32x32xf32>, vector<16x32xf32> -> vector<16x32xf32>
    %14 = vector.broadcast %5 : vector<1x32xf32> to vector<16x32xf32>
    %15 = arith.addf %13, %14 : vector<16x32xf32>
    %c0_5 = arith.constant 0 : index
    %c0_6 = arith.constant 0 : index
    %16 = vector.load %arg2[%c0_5, %c0_6] : memref<32x96xf32, #tpu.memory_space<vmem>>, vector<32x96xf32>
    %cst_7 = arith.constant dense<0.000000e+00> : vector<16x96xf32>
    %17 = tpu.matmul %15, %16, %cst_7 {dimension_numbers = #tpu.dot_dimension_numbers<[1], [0], [0], [1], [0, 0, 1, 1], [], []>} : vector<16x32xf32>, vector<32x96xf32>, vector<16x96xf32> -> vector<16x96xf32>
    %18 = vector.broadcast %12 : vector<1x96xf32> to vector<16x96xf32>
    %19 = arith.addf %17, %18 : vector<16x96xf32>
    %20 = vector.extract_strided_slice %19 {offsets = [0, 0], sizes = [8, 8], strides = [1, 1]} : vector<16x96xf32> to vector<8x8xf32>
    %21 = vector.extract_strided_slice %19 {offsets = [0, 32], sizes = [8, 8], strides = [1, 1]} : vector<16x96xf32> to vector<8x8xf32>
    %22 = vector.extract_strided_slice %19 {offsets = [0, 64], sizes = [8, 8], strides = [1, 1]} : vector<16x96xf32> to vector<8x8xf32>
    %cst_8 = arith.constant dense<0.000000e+00> : vector<8x8xf32>
    %23 = tpu.matmul %20, %21, %cst_8 {dimension_numbers = #tpu.dot_dimension_numbers<[1], [1], [0], [0], [0, 0, 1, 0], [], []>} : vector<8x8xf32>, vector<8x8xf32>, vector<8x8xf32> -> vector<8x8xf32>
    %cst_9 = arith.constant dense<0xFF800000> : vector<8xf32>
    %24 = vector.multi_reduction <maximumf>, %23, %cst_9 [1] : vector<8x8xf32> to vector<8xf32>
    %25 = vector.shape_cast %24 : vector<8xf32> to vector<8x1xf32>
    %26 = vector.broadcast %25 : vector<8x1xf32> to vector<8x8xf32>
    %27 = arith.subf %23, %26 : vector<8x8xf32>
    %28 = math.exp %27 : vector<8x8xf32>
    %cst_10 = arith.constant dense<0.000000e+00> : vector<8xf32>
    %29 = vector.multi_reduction <add>, %28, %cst_10 [1] : vector<8x8xf32> to vector<8xf32>
    %30 = vector.shape_cast %29 : vector<8xf32> to vector<8x1xf32>
    %31 = tpu.reciprocal %30 {approx = true} : vector<8x1xf32> -> vector<8x1xf32>
    %32 = vector.broadcast %31 : vector<8x1xf32> to vector<8x8xf32>
    %33 = arith.mulf %28, %32 : vector<8x8xf32>
    %cst_11 = arith.constant dense<0.000000e+00> : vector<8x8xf32>
    %34 = tpu.matmul %33, %22, %cst_11 {dimension_numbers = #tpu.dot_dimension_numbers<[1], [0], [0], [1], [0, 0, 1, 1], [], []>} : vector<8x8xf32>, vector<8x8xf32>, vector<8x8xf32> -> vector<8x8xf32>
    %35 = vector.extract_strided_slice %19 {offsets = [0, 8], sizes = [8, 8], strides = [1, 1]} : vector<16x96xf32> to vector<8x8xf32>
    %36 = vector.extract_strided_slice %19 {offsets = [0, 40], sizes = [8, 8], strides = [1, 1]} : vector<16x96xf32> to vector<8x8xf32>
    %37 = vector.extract_strided_slice %19 {offsets = [0, 72], sizes = [8, 8], strides = [1, 1]} : vector<16x96xf32> to vector<8x8xf32>
    %cst_12 = arith.constant dense<0.000000e+00> : vector<8x8xf32>
    %38 = tpu.matmul %35, %36, %cst_12 {dimension_numbers = #tpu.dot_dimension_numbers<[1], [1], [0], [0], [0, 0, 1, 0], [], []>} : vector<8x8xf32>, vector<8x8xf32>, vector<8x8xf32> -> vector<8x8xf32>
    %cst_13 = arith.constant dense<0xFF800000> : vector<8xf32>
    %39 = vector.multi_reduction <maximumf>, %38, %cst_13 [1] : vector<8x8xf32> to vector<8xf32>
    %40 = vector.shape_cast %39 : vector<8xf32> to vector<8x1xf32>
    %41 = vector.broadcast %40 : vector<8x1xf32> to vector<8x8xf32>
    %42 = arith.subf %38, %41 : vector<8x8xf32>
    %43 = math.exp %42 : vector<8x8xf32>
    %cst_14 = arith.constant dense<0.000000e+00> : vector<8xf32>
    %44 = vector.multi_reduction <add>, %43, %cst_14 [1] : vector<8x8xf32> to vector<8xf32>
    %45 = vector.shape_cast %44 : vector<8xf32> to vector<8x1xf32>
    %46 = tpu.reciprocal %45 {approx = true} : vector<8x1xf32> -> vector<8x1xf32>
    %47 = vector.broadcast %46 : vector<8x1xf32> to vector<8x8xf32>
    %48 = arith.mulf %43, %47 : vector<8x8xf32>
    %cst_15 = arith.constant dense<0.000000e+00> : vector<8x8xf32>
    %49 = tpu.matmul %48, %37, %cst_15 {dimension_numbers = #tpu.dot_dimension_numbers<[1], [0], [0], [1], [0, 0, 1, 1], [], []>} : vector<8x8xf32>, vector<8x8xf32>, vector<8x8xf32> -> vector<8x8xf32>
    %50 = vector.extract_strided_slice %19 {offsets = [0, 16], sizes = [8, 8], strides = [1, 1]} : vector<16x96xf32> to vector<8x8xf32>
    %51 = vector.extract_strided_slice %19 {offsets = [0, 48], sizes = [8, 8], strides = [1, 1]} : vector<16x96xf32> to vector<8x8xf32>
    %52 = vector.extract_strided_slice %19 {offsets = [0, 80], sizes = [8, 8], strides = [1, 1]} : vector<16x96xf32> to vector<8x8xf32>
    %cst_16 = arith.constant dense<0.000000e+00> : vector<8x8xf32>
    %53 = tpu.matmul %50, %51, %cst_16 {dimension_numbers = #tpu.dot_dimension_numbers<[1], [1], [0], [0], [0, 0, 1, 0], [], []>} : vector<8x8xf32>, vector<8x8xf32>, vector<8x8xf32> -> vector<8x8xf32>
    %cst_17 = arith.constant dense<0xFF800000> : vector<8xf32>
    %54 = vector.multi_reduction <maximumf>, %53, %cst_17 [1] : vector<8x8xf32> to vector<8xf32>
    %55 = vector.shape_cast %54 : vector<8xf32> to vector<8x1xf32>
    %56 = vector.broadcast %55 : vector<8x1xf32> to vector<8x8xf32>
    %57 = arith.subf %53, %56 : vector<8x8xf32>
    %58 = math.exp %57 : vector<8x8xf32>
    %cst_18 = arith.constant dense<0.000000e+00> : vector<8xf32>
    %59 = vector.multi_reduction <add>, %58, %cst_18 [1] : vector<8x8xf32> to vector<8xf32>
    %60 = vector.shape_cast %59 : vector<8xf32> to vector<8x1xf32>
    %61 = tpu.reciprocal %60 {approx = true} : vector<8x1xf32> -> vector<8x1xf32>
    %62 = vector.broadcast %61 : vector<8x1xf32> to vector<8x8xf32>
    %63 = arith.mulf %58, %62 : vector<8x8xf32>
    %cst_19 = arith.constant dense<0.000000e+00> : vector<8x8xf32>
    %64 = tpu.matmul %63, %52, %cst_19 {dimension_numbers = #tpu.dot_dimension_numbers<[1], [0], [0], [1], [0, 0, 1, 1], [], []>} : vector<8x8xf32>, vector<8x8xf32>, vector<8x8xf32> -> vector<8x8xf32>
    %65 = vector.extract_strided_slice %19 {offsets = [0, 24], sizes = [8, 8], strides = [1, 1]} : vector<16x96xf32> to vector<8x8xf32>
    %66 = vector.extract_strided_slice %19 {offsets = [0, 56], sizes = [8, 8], strides = [1, 1]} : vector<16x96xf32> to vector<8x8xf32>
    %67 = vector.extract_strided_slice %19 {offsets = [0, 88], sizes = [8, 8], strides = [1, 1]} : vector<16x96xf32> to vector<8x8xf32>
    %cst_20 = arith.constant dense<0.000000e+00> : vector<8x8xf32>
    %68 = tpu.matmul %65, %66, %cst_20 {dimension_numbers = #tpu.dot_dimension_numbers<[1], [1], [0], [0], [0, 0, 1, 0], [], []>} : vector<8x8xf32>, vector<8x8xf32>, vector<8x8xf32> -> vector<8x8xf32>
    %cst_21 = arith.constant dense<0xFF800000> : vector<8xf32>
    %69 = vector.multi_reduction <maximumf>, %68, %cst_21 [1] : vector<8x8xf32> to vector<8xf32>
    %70 = vector.shape_cast %69 : vector<8xf32> to vector<8x1xf32>
    %71 = vector.broadcast %70 : vector<8x1xf32> to vector<8x8xf32>
    %72 = arith.subf %68, %71 : vector<8x8xf32>
    %73 = math.exp %72 : vector<8x8xf32>
    %cst_22 = arith.constant dense<0.000000e+00> : vector<8xf32>
    %74 = vector.multi_reduction <add>, %73, %cst_22 [1] : vector<8x8xf32> to vector<8xf32>
    %75 = vector.shape_cast %74 : vector<8xf32> to vector<8x1xf32>
    %76 = tpu.reciprocal %75 {approx = true} : vector<8x1xf32> -> vector<8x1xf32>
    %77 = vector.broadcast %76 : vector<8x1xf32> to vector<8x8xf32>
    %78 = arith.mulf %73, %77 : vector<8x8xf32>
    %cst_23 = arith.constant dense<0.000000e+00> : vector<8x8xf32>
    %79 = tpu.matmul %78, %67, %cst_23 {dimension_numbers = #tpu.dot_dimension_numbers<[1], [0], [0], [1], [0, 0, 1, 1], [], []>} : vector<8x8xf32>, vector<8x8xf32>, vector<8x8xf32> -> vector<8x8xf32>
    %80 = tpu.concatenate %34, %49, %64, %79 in 1 : vector<8x8xf32>, vector<8x8xf32>, vector<8x8xf32>, vector<8x8xf32> -> vector<8x32xf32>
    %81 = vector.extract_strided_slice %19 {offsets = [8, 0], sizes = [8, 8], strides = [1, 1]} : vector<16x96xf32> to vector<8x8xf32>
    %82 = vector.extract_strided_slice %19 {offsets = [8, 32], sizes = [8, 8], strides = [1, 1]} : vector<16x96xf32> to vector<8x8xf32>
    %83 = vector.extract_strided_slice %19 {offsets = [8, 64], sizes = [8, 8], strides = [1, 1]} : vector<16x96xf32> to vector<8x8xf32>
    %cst_24 = arith.constant dense<0.000000e+00> : vector<8x8xf32>
    %84 = tpu.matmul %81, %82, %cst_24 {dimension_numbers = #tpu.dot_dimension_numbers<[1], [1], [0], [0], [0, 0, 1, 0], [], []>} : vector<8x8xf32>, vector<8x8xf32>, vector<8x8xf32> -> vector<8x8xf32>
    %cst_25 = arith.constant dense<0xFF800000> : vector<8xf32>
    %85 = vector.multi_reduction <maximumf>, %84, %cst_25 [1] : vector<8x8xf32> to vector<8xf32>
    %86 = vector.shape_cast %85 : vector<8xf32> to vector<8x1xf32>
    %87 = vector.broadcast %86 : vector<8x1xf32> to vector<8x8xf32>
    %88 = arith.subf %84, %87 : vector<8x8xf32>
    %89 = math.exp %88 : vector<8x8xf32>
    %cst_26 = arith.constant dense<0.000000e+00> : vector<8xf32>
    %90 = vector.multi_reduction <add>, %89, %cst_26 [1] : vector<8x8xf32> to vector<8xf32>
    %91 = vector.shape_cast %90 : vector<8xf32> to vector<8x1xf32>
    %92 = tpu.reciprocal %91 {approx = true} : vector<8x1xf32> -> vector<8x1xf32>
    %93 = vector.broadcast %92 : vector<8x1xf32> to vector<8x8xf32>
    %94 = arith.mulf %89, %93 : vector<8x8xf32>
    %cst_27 = arith.constant dense<0.000000e+00> : vector<8x8xf32>
    %95 = tpu.matmul %94, %83, %cst_27 {dimension_numbers = #tpu.dot_dimension_numbers<[1], [0], [0], [1], [0, 0, 1, 1], [], []>} : vector<8x8xf32>, vector<8x8xf32>, vector<8x8xf32> -> vector<8x8xf32>
    %96 = vector.extract_strided_slice %19 {offsets = [8, 8], sizes = [8, 8], strides = [1, 1]} : vector<16x96xf32> to vector<8x8xf32>
    %97 = vector.extract_strided_slice %19 {offsets = [8, 40], sizes = [8, 8], strides = [1, 1]} : vector<16x96xf32> to vector<8x8xf32>
    %98 = vector.extract_strided_slice %19 {offsets = [8, 72], sizes = [8, 8], strides = [1, 1]} : vector<16x96xf32> to vector<8x8xf32>
    %cst_28 = arith.constant dense<0.000000e+00> : vector<8x8xf32>
    %99 = tpu.matmul %96, %97, %cst_28 {dimension_numbers = #tpu.dot_dimension_numbers<[1], [1], [0], [0], [0, 0, 1, 0], [], []>} : vector<8x8xf32>, vector<8x8xf32>, vector<8x8xf32> -> vector<8x8xf32>
    %cst_29 = arith.constant dense<0xFF800000> : vector<8xf32>
    %100 = vector.multi_reduction <maximumf>, %99, %cst_29 [1] : vector<8x8xf32> to vector<8xf32>
    %101 = vector.shape_cast %100 : vector<8xf32> to vector<8x1xf32>
    %102 = vector.broadcast %101 : vector<8x1xf32> to vector<8x8xf32>
    %103 = arith.subf %99, %102 : vector<8x8xf32>
    %104 = math.exp %103 : vector<8x8xf32>
    %cst_30 = arith.constant dense<0.000000e+00> : vector<8xf32>
    %105 = vector.multi_reduction <add>, %104, %cst_30 [1] : vector<8x8xf32> to vector<8xf32>
    %106 = vector.shape_cast %105 : vector<8xf32> to vector<8x1xf32>
    %107 = tpu.reciprocal %106 {approx = true} : vector<8x1xf32> -> vector<8x1xf32>
    %108 = vector.broadcast %107 : vector<8x1xf32> to vector<8x8xf32>
    %109 = arith.mulf %104, %108 : vector<8x8xf32>
    %cst_31 = arith.constant dense<0.000000e+00> : vector<8x8xf32>
    %110 = tpu.matmul %109, %98, %cst_31 {dimension_numbers = #tpu.dot_dimension_numbers<[1], [0], [0], [1], [0, 0, 1, 1], [], []>} : vector<8x8xf32>, vector<8x8xf32>, vector<8x8xf32> -> vector<8x8xf32>
    %111 = vector.extract_strided_slice %19 {offsets = [8, 16], sizes = [8, 8], strides = [1, 1]} : vector<16x96xf32> to vector<8x8xf32>
    %112 = vector.extract_strided_slice %19 {offsets = [8, 48], sizes = [8, 8], strides = [1, 1]} : vector<16x96xf32> to vector<8x8xf32>
    %113 = vector.extract_strided_slice %19 {offsets = [8, 80], sizes = [8, 8], strides = [1, 1]} : vector<16x96xf32> to vector<8x8xf32>
    %cst_32 = arith.constant dense<0.000000e+00> : vector<8x8xf32>
    %114 = tpu.matmul %111, %112, %cst_32 {dimension_numbers = #tpu.dot_dimension_numbers<[1], [1], [0], [0], [0, 0, 1, 0], [], []>} : vector<8x8xf32>, vector<8x8xf32>, vector<8x8xf32> -> vector<8x8xf32>
    %cst_33 = arith.constant dense<0xFF800000> : vector<8xf32>
    %115 = vector.multi_reduction <maximumf>, %114, %cst_33 [1] : vector<8x8xf32> to vector<8xf32>
    %116 = vector.shape_cast %115 : vector<8xf32> to vector<8x1xf32>
    %117 = vector.broadcast %116 : vector<8x1xf32> to vector<8x8xf32>
    %118 = arith.subf %114, %117 : vector<8x8xf32>
    %119 = math.exp %118 : vector<8x8xf32>
    %cst_34 = arith.constant dense<0.000000e+00> : vector<8xf32>
    %120 = vector.multi_reduction <add>, %119, %cst_34 [1] : vector<8x8xf32> to vector<8xf32>
    %121 = vector.shape_cast %120 : vector<8xf32> to vector<8x1xf32>
    %122 = tpu.reciprocal %121 {approx = true} : vector<8x1xf32> -> vector<8x1xf32>
    %123 = vector.broadcast %122 : vector<8x1xf32> to vector<8x8xf32>
    %124 = arith.mulf %119, %123 : vector<8x8xf32>
    %cst_35 = arith.constant dense<0.000000e+00> : vector<8x8xf32>
    %125 = tpu.matmul %124, %113, %cst_35 {dimension_numbers = #tpu.dot_dimension_numbers<[1], [0], [0], [1], [0, 0, 1, 1], [], []>} : vector<8x8xf32>, vector<8x8xf32>, vector<8x8xf32> -> vector<8x8xf32>
    %126 = vector.extract_strided_slice %19 {offsets = [8, 24], sizes = [8, 8], strides = [1, 1]} : vector<16x96xf32> to vector<8x8xf32>
    %127 = vector.extract_strided_slice %19 {offsets = [8, 56], sizes = [8, 8], strides = [1, 1]} : vector<16x96xf32> to vector<8x8xf32>
    %128 = vector.extract_strided_slice %19 {offsets = [8, 88], sizes = [8, 8], strides = [1, 1]} : vector<16x96xf32> to vector<8x8xf32>
    %cst_36 = arith.constant dense<0.000000e+00> : vector<8x8xf32>
    %129 = tpu.matmul %126, %127, %cst_36 {dimension_numbers = #tpu.dot_dimension_numbers<[1], [1], [0], [0], [0, 0, 1, 0], [], []>} : vector<8x8xf32>, vector<8x8xf32>, vector<8x8xf32> -> vector<8x8xf32>
    %cst_37 = arith.constant dense<0xFF800000> : vector<8xf32>
    %130 = vector.multi_reduction <maximumf>, %129, %cst_37 [1] : vector<8x8xf32> to vector<8xf32>
    %131 = vector.shape_cast %130 : vector<8xf32> to vector<8x1xf32>
    %132 = vector.broadcast %131 : vector<8x1xf32> to vector<8x8xf32>
    %133 = arith.subf %129, %132 : vector<8x8xf32>
    %134 = math.exp %133 : vector<8x8xf32>
    %cst_38 = arith.constant dense<0.000000e+00> : vector<8xf32>
    %135 = vector.multi_reduction <add>, %134, %cst_38 [1] : vector<8x8xf32> to vector<8xf32>
    %136 = vector.shape_cast %135 : vector<8xf32> to vector<8x1xf32>
    %137 = tpu.reciprocal %136 {approx = true} : vector<8x1xf32> -> vector<8x1xf32>
    %138 = vector.broadcast %137 : vector<8x1xf32> to vector<8x8xf32>
    %139 = arith.mulf %134, %138 : vector<8x8xf32>
    %cst_39 = arith.constant dense<0.000000e+00> : vector<8x8xf32>
    %140 = tpu.matmul %139, %128, %cst_39 {dimension_numbers = #tpu.dot_dimension_numbers<[1], [0], [0], [1], [0, 0, 1, 1], [], []>} : vector<8x8xf32>, vector<8x8xf32>, vector<8x8xf32> -> vector<8x8xf32>
    %141 = tpu.concatenate %95, %110, %125, %140 in 1 : vector<8x8xf32>, vector<8x8xf32>, vector<8x8xf32>, vector<8x8xf32> -> vector<8x32xf32>
    %142 = tpu.concatenate %80, %141 in 0 : vector<8x32xf32>, vector<8x32xf32> -> vector<16x32xf32>
    %cst_40 = arith.constant dense<0.000000e+00> : vector<16x32xf32>
    %143 = tpu.matmul %142, %3, %cst_40 {dimension_numbers = #tpu.dot_dimension_numbers<[1], [0], [0], [1], [0, 0, 1, 1], [], []>} : vector<16x32xf32>, vector<32x32xf32>, vector<16x32xf32> -> vector<16x32xf32>
    %144 = vector.broadcast %6 : vector<1x32xf32> to vector<16x32xf32>
    %145 = arith.addf %143, %144 : vector<16x32xf32>
    %146 = arith.addf %15, %145 : vector<16x32xf32>
    %cst_41 = arith.constant dense<0.000000e+00> : vector<16xf32>
    %147 = vector.multi_reduction <add>, %146, %cst_41 [1] : vector<16x32xf32> to vector<16xf32>
    %148 = vector.shape_cast %147 : vector<16xf32> to vector<16x1xf32>
    %cst_42 = arith.constant 3.200000e+01 : f32
    %149 = vector.broadcast %cst_42 : f32 to vector<16x1xf32>
    %150 = arith.divf %148, %149 : vector<16x1xf32>
    %151 = arith.mulf %146, %146 : vector<16x32xf32>
    %cst_43 = arith.constant dense<0.000000e+00> : vector<16xf32>
    %152 = vector.multi_reduction <add>, %151, %cst_43 [1] : vector<16x32xf32> to vector<16xf32>
    %153 = vector.shape_cast %152 : vector<16xf32> to vector<16x1xf32>
    %cst_44 = arith.constant 3.200000e+01 : f32
    %154 = vector.broadcast %cst_44 : f32 to vector<16x1xf32>
    %155 = arith.divf %153, %154 : vector<16x1xf32>
    %156 = arith.mulf %150, %150 : vector<16x1xf32>
    %157 = arith.subf %155, %156 : vector<16x1xf32>
    %158 = vector.broadcast %150 : vector<16x1xf32> to vector<16x32xf32>
    %159 = arith.subf %146, %158 : vector<16x32xf32>
    %cst_45 = arith.constant 9.99999974E-6 : f32
    %160 = vector.broadcast %cst_45 : f32 to vector<16x1xf32>
    %161 = arith.addf %157, %160 : vector<16x1xf32>
    %162 = math.rsqrt %161 : vector<16x1xf32>
    %163 = vector.broadcast %162 : vector<16x1xf32> to vector<16x32xf32>
    %164 = arith.mulf %159, %163 : vector<16x32xf32>
    %165 = vector.broadcast %7 : vector<1x32xf32> to vector<16x32xf32>
    %166 = arith.mulf %164, %165 : vector<16x32xf32>
    %167 = vector.broadcast %8 : vector<1x32xf32> to vector<16x32xf32>
    %168 = arith.addf %166, %167 : vector<16x32xf32>
    %169 = arith.truncf %168 : vector<16x32xf32> to vector<16x32xbf16>
    %c0_46 = arith.constant 0 : index
    %c0_47 = arith.constant 0 : index
    %170 = vector.load %arg5[%c0_46, %c0_47] : memref<32x512xbf16, #tpu.memory_space<vmem>>, vector<32x512xbf16>
    %cst_48 = arith.constant dense<0.000000e+00> : vector<16x512xf32>
    %171 = tpu.matmul %169, %170, %cst_48 {dimension_numbers = #tpu.dot_dimension_numbers<[1], [0], [0], [1], [0, 0, 1, 1], [], []>} : vector<16x32xbf16>, vector<32x512xbf16>, vector<16x512xf32> -> vector<16x512xf32>
    %c0_49 = arith.constant 0 : index
    %c0_50 = arith.constant 0 : index
    %172 = vector.load %arg4[%c0_49, %c0_50] : memref<1x512xf32, #tpu.memory_space<vmem>>, vector<1x512xf32>
    %173 = vector.broadcast %172 : vector<1x512xf32> to vector<16x512xf32>
    %174 = arith.addf %171, %173 : vector<16x512xf32>
    %cst_51 = arith.constant 0.000000e+00 : f32
    %175 = vector.broadcast %cst_51 : f32 to vector<16x512xf32>
    %176 = arith.maximumf %174, %175 : vector<16x512xf32>
    %177 = arith.truncf %176 : vector<16x512xf32> to vector<16x512xbf16>
    %c0_52 = arith.constant 0 : index
    %c0_53 = arith.constant 0 : index
    %178 = vector.load %arg6[%c0_52, %c0_53] : memref<512x32xbf16, #tpu.memory_space<vmem>>, vector<512x32xbf16>
    %cst_54 = arith.constant dense<0.000000e+00> : vector<16x32xf32>
    %179 = tpu.matmul %177, %178, %cst_54 {dimension_numbers = #tpu.dot_dimension_numbers<[1], [0], [0], [1], [0, 0, 1, 1], [], []>} : vector<16x512xbf16>, vector<512x32xbf16>, vector<16x32xf32> -> vector<16x32xf32>
    %180 = vector.broadcast %9 : vector<1x32xf32> to vector<16x32xf32>
    %181 = arith.addf %179, %180 : vector<16x32xf32>
    %182 = arith.addf %168, %181 : vector<16x32xf32>
    %cst_55 = arith.constant dense<0.000000e+00> : vector<16xf32>
    %183 = vector.multi_reduction <add>, %182, %cst_55 [1] : vector<16x32xf32> to vector<16xf32>
    %184 = vector.shape_cast %183 : vector<16xf32> to vector<16x1xf32>
    %cst_56 = arith.constant 3.200000e+01 : f32
    %185 = vector.broadcast %cst_56 : f32 to vector<16x1xf32>
    %186 = arith.divf %184, %185 : vector<16x1xf32>
    %187 = arith.mulf %182, %182 : vector<16x32xf32>
    %cst_57 = arith.constant dense<0.000000e+00> : vector<16xf32>
    %188 = vector.multi_reduction <add>, %187, %cst_57 [1] : vector<16x32xf32> to vector<16xf32>
    %189 = vector.shape_cast %188 : vector<16xf32> to vector<16x1xf32>
    %cst_58 = arith.constant 3.200000e+01 : f32
    %190 = vector.broadcast %cst_58 : f32 to vector<16x1xf32>
    %191 = arith.divf %189, %190 : vector<16x1xf32>
    %192 = arith.mulf %186, %186 : vector<16x1xf32>
    %193 = arith.subf %191, %192 : vector<16x1xf32>
    %194 = vector.broadcast %186 : vector<16x1xf32> to vector<16x32xf32>
    %195 = arith.subf %182, %194 : vector<16x32xf32>
    %cst_59 = arith.constant 9.99999974E-6 : f32
    %196 = vector.broadcast %cst_59 : f32 to vector<16x1xf32>
    %197 = arith.addf %193, %196 : vector<16x1xf32>
    %198 = math.rsqrt %197 : vector<16x1xf32>
    %199 = vector.broadcast %198 : vector<16x1xf32> to vector<16x32xf32>
    %200 = arith.mulf %195, %199 : vector<16x32xf32>
    %201 = vector.broadcast %10 : vector<1x32xf32> to vector<16x32xf32>
    %202 = arith.mulf %200, %201 : vector<16x32xf32>
    %203 = vector.broadcast %11 : vector<1x32xf32> to vector<16x32xf32>
    %204 = arith.addf %202, %203 : vector<16x32xf32>
    %c0_60 = arith.constant 0 : index
    %c0_61 = arith.constant 0 : index
    %205 = vector.load %arg7[%c0_60, %c0_61] : memref<16x32xf32, #tpu.memory_space<vmem>>, vector<16x32xf32>
    tpu.vector_store %arg7[%c0_60, %c0_61], %204 {strides = array<i32>} : memref<16x32xf32, #tpu.memory_space<vmem>>, vector<16x32xf32>,
    return
  }
}

</mosaic_0001>

<bundles_post_ra>
// kernel: mul.9
= control target key start
LH: loop header
LB: loop body
LE: loop exit
PB: predicated region body
PF: predicated region fallthrough
CT: control target
= control target key end

     0   :  { %s34_s0 = inlined_call_operand.vmem [shape: f32[1,96], index: 0, kind: input, shape index: {}]   ;;  %s35_s1 = inlined_call_operand.vmem [shape: f32[1,96], index: 1, kind: input, shape index: {}]   ;;  %s36_s2 = inlined_call_operand.vmem [shape: f32[1,96], index: 2, kind: output, shape index: {}]  }
   0x1   :  { %v3_v0 = vld [vmem:[%s34_s0] sm:$0x1] }
   0x2   :  { %v4_v1 = vld [vmem:[%s35_s1] sm:$0x1] }
   0x3   :  { %v7_v2 = vmul.f32 %v4_v1, %v3_v0 }
   0x5   :  { %9 = vst [vmem:[%s36_s2] sm:$0x1] %v7_v2 }

// kernel: attention_block.1
= control target key start
LH: loop header
LB: loop body
LE: loop exit
PB: predicated region body
PF: predicated region fallthrough
CT: control target
= control target key end

     0   :  { %vm43_vm0 = vcmask 261120   ;;  %s3160_s0 = inlined_call_operand.vmem [shape: f32[16,32], index: 0, kind: input, shape index: {}]   ;;  %s3161_s1 = inlined_call_operand.vmem [shape: f32[64,32], index: 1, kind: input, shape index: {}]   ;;  %s3162_s2 = inlined_call_operand.vmem [shape: f32[32,96], index: 2, kind: input, shape index: {}]   ;;  %s3163_s3 = inlined_call_operand.vmem [shape: f32[8,96], index: 3, kind: input, shape index: {}]   ;;  %s3164_s4 = inlined_call_operand.vmem [shape: f32[1,512], index: 4, kind: input, shape index: {}]   ;;  %s3165_s5 = inlined_call_operand.vmem [shape: bf16[32,512], index: 5, kind: input, shape index: {}]   ;;  %s3166_s6 = inlined_call_operand.vmem [shape: bf16[512,32], index: 6, kind: input, shape index: {}]   ;;  %s3167_s7 = inlined_call_operand.hbm [shape: f32[16,32], index: 7, kind: output, shape index: {}]  }
   0x1   :  { %v30_v0 = vld [vmem:[%s3161_s1] sm:$0xff]  ;;  %v31_v1 = vld [vmem:[%s3161_s1 + $0x8] sm:$0xff]  ;;  %v32_v2 = vld [vmem:[%s3161_s1 + $0x10] sm:$0xff] }
   0x2   :  { %v2550_v3 = vpack.c.bf16 %v31_v1, %v30_v0  ;;  %v33_v4 = vld [vmem:[%s3161_s1 + $0x18] sm:$0xff]  ;;  %v28_v5 = vld [vmem:[%s3160_s0] sm:$0xff]  ;;  %v126_v8 = vld [vmem:[%s3162_s2 + $0x8] sm:$0xff] }
   0x3   :  { %v2554_v6 = vpack.c.bf16 %v33_v4, %v32_v2  ;;  %2445 = vmatprep.mubr.msk.f32.mxu0 %vm43_vm0, %v28_v5  ;;  %v125_v7 = vld [vmem:[%s3162_s2] sm:$0xff]  ;;  %v29_v10 = vld [vmem:[%s3160_s0 + $0x8] sm:$0xff] }
   0x4   :  { %2551 = vmatprep.subr.bf16.mxu0 %v2550_v3  ;;  %v2558_v9 = vpack.c.bf16 %v126_v8, %v125_v7 }
   0x5   :  { %2553 = vmatpush3.bf16.msra.mxu0 %v2550_v3 }
   0x6   :  { %2555 = vmatprep.subr.bf16.mxu0 %v2554_v6  ;;  %2559 = vmatprep.subr.bf16.mxu1 %v2558_v9 }
   0x7   :  { %2561 = vmatpush3.bf16.msra.mxu1 %v2558_v9 }
   0x9   :  { %2557 = vmatpush3.bf16.msra.mxu0 %v2554_v6 }
   0xc   :  { %2446 = vmatmul.mubr.msk.f32.vlgmr.msra.gmra.mrb[0].mxu0 %vm43_vm0, %v29_v10 }
   0xd   :  { %12 = vsyncpa [#allocation3], 0  ;;  %v127_v11 = vld [vmem:[%s3162_s2 + $0x10] sm:$0xff]  ;;  %v128_v12 = vld [vmem:[%s3162_s2 + $0x18] sm:$0xff]  ;;  %v39_v14 = vlaneseq  ;;  %v2702_v23 = vmov 0.0   ;;  %vm2703_vm1 = vmmov 0  }
   0xe   :  { %v2562_v13 = vpack.c.bf16 %v128_v12, %v127_v11  ;;  %v2799_v17 = vld [vmem:[%s3163_s3] sm:$0xff]  ;;  %2469 = vmatprep.subr.mxu0 %v2702_v23  ;;  %2471 = vmatprep.mubr.msk.f32.mxu0 %vm2703_vm1, %v2702_v23  ;;  %s2704_s2 = smov 120   ;;  %s2705_s22 = smov 96   ;;  %vm217_vm2 = vcmask 64512   ;;  %vm887_vm3 = vcmask 130048   ;;  %vm889_vm4 = vcmask 195584  }
   0xf   :  { %v2793_v15 = vshrl.u32 %v39_v14, 7  ;;  %s2706_s23 = smov 80   ;;  %s2707_s24 = smov 88  }
  0x10   :  { %2563 = vmatprep.subr.bf16.mxu1 %v2562_v13  ;;  %s2708_s25 = smov 72   ;;  %s2709_s26 = smov 112  }
  0x11   :  { %2565 = vmatpush3.bf16.msra.mxu1 %v2562_v13  ;;  %v41_v16 = vsub.s32 0, %v2793_v15  ;;  %v131_v24 = vsub.s32 7, %v2793_v15  ;;  %s2710_s27 = smov 104   ;;  %s2711_s28 = smov 56  }
  0x12   :  { %2459 = vmatprep.subr.mxu1 %v2702_v23  ;;  %s2712_s29 = smov 64   ;;  %s2713_s30 = smov 40  }
  0x13   :  { %v42_v18 = vrot.slane %v2799_v17, %v41_v16  ;;  %v132_v25 = vrot.slane %v2799_v17, %v131_v24  ;;  %s2714_s8 = smov 48   ;;  %s2715_s9 = smov 8  }
  0x14   :  { %s2716_s10 = smov 16   ;;  %s2717_s11 = smov 24  }
  0xdf   :  { %v2447_v19 = vpop.f32.mrb[0].mxu0 }
  0xe0   :  { %v116_v20 = vpop.f32.mrb[1].mxu0  ;;  %v2806_v22 = vadd.f32 %v2447_v19, %v42_v18 }
  0xe1   :  { %v2804_v21 = vadd.f32 %v116_v20, %v42_v18 }
  0xe3   :  { %2456 = vmatprep.mubr.msk.f32.mxu1 %vm43_vm0, %v2804_v21 }
  0xe4   :  { %2457 = vmatmul.mubr.msk.f32.vlgmr.msra.gmra.mrb[0].mxu1 %vm43_vm0, %v2806_v22 }
  0xe5   :  { %2461 = vmatprep.mubr.msk.f32.mxu1 %vm2703_vm1, %v2702_v23 }
 0x1b7   :  { %v2458_v26 = vpop.f32.mrb[0].mxu1 }
 0x1b8   :  { %v205_v27 = vpop.f32.mrb[1].mxu1  ;;  %v2828_v29 = vadd.f32 %v2458_v26, %v132_v25 }
 0x1b9   :  { %v2820_v28 = vadd.f32 %v205_v27, %v132_v25 }
 0x1bb   :  { %379 = vrot.lane.b32.xlu1 %v2820_v28, %s2704_s2  ;;  %215 = vrot.lane.b32.xlu0 %v2820_v28, %s2705_s22 }
 0x1bf   :  { %546 = vrot.lane.b32.xlu1 %v2820_v28, %s2706_s23  ;;  %381 = vrot.lane.b32.xlu0 %v2820_v28, %s2707_s24 }
 0x1c3   :  { %711 = vrot.lane.b32.xlu1 %v2820_v28, %s2708_s25  ;;  %544 = vrot.lane.b32.xlu0 %v2820_v28, %s2709_s26 }
 0x1c7   :  { %892 = vrot.lane.b32.xlu1 %v2828_v29, %s2705_s22  ;;  %709 = vrot.lane.b32.xlu0 %v2820_v28, %s2710_s27 }
 0x1cb   :  { %1055 = vrot.lane.b32.xlu1 %v2828_v29, %s2704_s2  ;;  %1057 = vrot.lane.b32.xlu0 %v2828_v29, %s2707_s24  ;;  %s2719_s2 = smov [#allocation2]  }
 0x1cc   :  { %s2260_s22 = sshll.u32 %s2719_s2, 4  ;;  %s2261_s22 = int_to_ptr.vmem [resolvable:$true] %s2260_s22 }
 0x1cd   :  { %p2683_p1 = scmp.lt.s32.totalorder %s2261_s22, %s2261_s22 }
 0x1cf   :  { %1220 = vrot.lane.b32.xlu1 %v2828_v29, %s2709_s26  ;;  %1222 = vrot.lane.b32.xlu0 %v2828_v29, %s2706_s23  ;;  %s2678_s23 = scalar_lea.vmem %s2261_s22, 256 }
 0x1d0   :  { %p2679_p0 = scmp.ne.s32.totalorder %s2261_s22, %s2678_s23  ;;  %p2684_p2 = scmp.lt.s32.totalorder %s2678_s23, %s2678_s23 }
 0x1d2   :  { %p2685_p3 = por %p2684_p2, %p2683_p1 }
 0x1d3   :  { %1385 = vrot.lane.b32.xlu1 %v2828_v29, %s2710_s27  ;;  %1387 = vrot.lane.b32.xlu0 %v2828_v29, %s2708_s25 }
 0x1d4   :  { %p2686_p4 = pnand %p2685_p3, %p2679_p0 }
 0x1d7   :  { %468 = vrot.lane.b32.xlu1 %v2820_v28, %s2711_s28  ;;  %303 = vrot.lane.b32.xlu0 %v2820_v28, %s2712_s29 }
 0x22d   :  { %v380_v30 = vpop.permute.xlu1 %379  ;;  %v216_v31 = vpop.permute.xlu0 %215 }
 0x22e   :  { %2460 = vmatpush3.xpose.msk.msra.mxu1 %vm217_vm2, %v216_v31 }
 0x22f   :  { %2464 = vmatprep.subr.mxu1 %v2702_v23 }
 0x231   :  { %v547_v32 = vpop.permute.xlu1 %546  ;;  %2462 = vmatmul.mubr.msk.f32.vlgmr.msra.gmra.mrb[2].mxu1 %vm217_vm2, %v2820_v28  ;;  %v382_v33 = vpop.permute.xlu0 %381 }
 0x232   :  { %2470 = vmatpush3.xpose.msk.msra.mxu0 %vm217_vm2, %v382_v33  ;;  %2466 = vmatprep.mubr.msk.f32.mxu1 %vm2703_vm1, %v2702_v23 }
 0x233   :  { %2479 = vmatprep.subr.mxu0 %v2702_v23 }
 0x235   :  { %v712_v34 = vpop.permute.xlu1 %711  ;;  %2472 = vmatmul.mubr.msk.f32.vlgmr.msra.gmra.mrb[2].mxu0 %vm217_vm2, %v380_v30  ;;  %v545_v35 = vpop.permute.xlu0 %544 }
 0x236   :  { %2480 = vmatpush3.xpose.msk.msra.mxu0 %vm217_vm2, %v547_v32  ;;  %2481 = vmatprep.mubr.msk.f32.mxu0 %vm2703_vm1, %v2702_v23 }
 0x237   :  { %2489 = vmatprep.subr.mxu0 %v2702_v23 }
 0x239   :  { %2482 = vmatmul.mubr.msk.f32.vlgmr.msra.gmra.mrb[4].mxu0 %vm217_vm2, %v545_v35  ;;  %v710_v36 = vpop.permute.xlu0 %709  ;;  %v893_v37 = vpop.permute.xlu1 %892 }
 0x23a   :  { %2490 = vmatpush3.xpose.msk.msra.mxu0 %vm217_vm2, %v712_v34  ;;  %2491 = vmatprep.mubr.msk.f32.mxu0 %vm2703_vm1, %v2702_v23 }
 0x23b   :  { %2499 = vmatprep.subr.mxu0 %v2702_v23 }
 0x23d   :  { %2492 = vmatmul.mubr.msk.f32.vlgmr.msra.gmra.mrb[6].mxu0 %vm217_vm2, %v710_v36  ;;  %v1058_v38 = vpop.permute.xlu0 %1057  ;;  %v1056_v39 = vpop.permute.xlu1 %1055 }
 0x23e   :  { %2500 = vmatpush3.xpose.msk.msra.mxu0 %vm217_vm2, %v893_v37  ;;  %2501 = vmatprep.mubr.msk.f32.mxu0 %vm2703_vm1, %v2702_v23 }
 0x23f   :  { %2509 = vmatprep.subr.mxu0 %v2702_v23 }
 0x241   :  { %2502 = vmatmul.mubr.msk.f32.vlgmr.msra.gmra.mrb[8].mxu0 %vm217_vm2, %v2828_v29  ;;  %v1223_v40 = vpop.permute.xlu0 %1222  ;;  %v1221_v42 = vpop.permute.xlu1 %1220 }
 0x242   :  { %2510 = vmatpush3.xpose.msk.msra.mxu0 %vm217_vm2, %v1058_v38  ;;  %2511 = vmatprep.mubr.msk.f32.mxu0 %vm2703_vm1, %v2702_v23 }
 0x243   :  { %2519 = vmatprep.subr.mxu0 %v2702_v23 }
 0x245   :  { %2512 = vmatmul.mubr.msk.f32.vlgmr.msra.gmra.mrb[10].mxu0 %vm217_vm2, %v1056_v39  ;;  %v1388_v41 = vpop.permute.xlu0 %1387  ;;  %v1386_v44 = vpop.permute.xlu1 %1385 }
 0x246   :  { %2520 = vmatpush3.xpose.msk.msra.mxu0 %vm217_vm2, %v1223_v40  ;;  %2521 = vmatprep.mubr.msk.f32.mxu0 %vm2703_vm1, %v2702_v23 }
 0x247   :  { %2529 = vmatprep.subr.mxu0 %v2702_v23 }
 0x249   :  { %2522 = vmatmul.mubr.msk.f32.vlgmr.msra.gmra.mrb[12].mxu0 %vm217_vm2, %v1221_v42  ;;  %v304_v43 = vpop.permute.xlu0 %303  ;;  %v2894_v5 = vpop.permute.xlu1 %468 }
 0x24a   :  { %2465 = vmatpush3.msra.mxu1 %v304_v43  ;;  %2530 = vmatpush3.xpose.msk.msra.mxu0 %vm217_vm2, %v1388_v41 }
 0x24b   :  { %2531 = vmatprep.mubr.msk.f32.mxu0 %vm2703_vm1, %v2702_v23  ;;  %2474 = vmatprep.subr.mxu1 %v2702_v23 }
 0x24d   :  { %2532 = vmatmul.mubr.msk.f32.vlgmr.msra.gmra.mrb[14].mxu0 %vm217_vm2, %v1386_v44 }
 0x304   :  { %v288_v45 = vpop.f32.mrb[2].mxu1 }
 0x305   :  { %v2463_v46 = vpop.f32.mrb[3].mxu1  ;;  %v292_v47 = vsel %vm217_vm2, %v288_v45, -inf }
 0x306   :  { %293 = vmax.xlane.f32.xlu0 %v292_v47 }
 0x308   :  { %v453_v48 = vpop.f32.mrb[2].mxu0 }
 0x309   :  { %v2473_v49 = vpop.f32.mrb[3].mxu0  ;;  %v457_v50 = vsel %vm217_vm2, %v453_v48, -inf }
 0x30a   :  { %458 = vmax.xlane.f32.xlu1 %v457_v50 }
 0x30c   :  { %v618_v51 = vpop.f32.mrb[4].mxu0 }
 0x30d   :  { %v2483_v52 = vpop.f32.mrb[5].mxu0  ;;  %v622_v53 = vsel %vm217_vm2, %v618_v51, -inf }
 0x30e   :  { %623 = vmax.xlane.f32.xlu0 %v622_v53 }
 0x310   :  { %v783_v54 = vpop.f32.mrb[6].mxu0 }
 0x311   :  { %v2493_v55 = vpop.f32.mrb[7].mxu0  ;;  %v787_v56 = vsel %vm217_vm2, %v783_v54, -inf }
 0x312   :  { %788 = vmax.xlane.f32.xlu0 %v787_v56 }
 0x314   :  { %v964_v57 = vpop.f32.mrb[8].mxu0 }
 0x315   :  { %v2503_v58 = vpop.f32.mrb[9].mxu0  ;;  %v968_v59 = vsel %vm217_vm2, %v964_v57, -inf }
 0x316   :  { %969 = vmax.xlane.f32.xlu1 %v968_v59 }
 0x318   :  { %v1129_v60 = vpop.f32.mrb[10].mxu0 }
 0x319   :  { %v2513_v61 = vpop.f32.mrb[11].mxu0  ;;  %v1133_v62 = vsel %vm217_vm2, %v1129_v60, -inf }
 0x31a   :  { %1134 = vmax.xlane.f32.xlu0 %v1133_v62 }
 0x31c   :  { %v1294_v63 = vpop.f32.mrb[12].mxu0 }
 0x31d   :  { %v2523_v0 = vpop.f32.mrb[13].mxu0  ;;  %v1298_v1 = vsel %vm217_vm2, %v1294_v63, -inf }
 0x31e   :  { %1299 = vmax.xlane.f32.xlu1 %v1298_v1 }
 0x320   :  { %v1459_v2 = vpop.f32.mrb[14].mxu0 }
 0x321   :  { %v2533_v3 = vpop.f32.mrb[15].mxu0  ;;  %v1463_v4 = vsel %vm217_vm2, %v1459_v2, -inf }
 0x322   :  { %1464 = vmax.xlane.f32.xlu0 %v1463_v4 }
 0x32f   :  { %798 = vrot.lane.b32.xlu1 %v2820_v28, %s2713_s30 }
 0x338   :  { %633 = vrot.lane.b32.xlu0 %v2820_v28, %s2714_s8 }
 0x393   :  { %v294_v6 = vpop.xlane.xlu0 %293 }
 0x394   :  { %v295_v7 = vsub.f32 %v288_v45, %v294_v6 }
 0x396   :  { %v296_v8 = vmul.f32 1.442695, %v295_v7 }
 0x397   :  { %v459_v9 = vpop.xlane.xlu1 %458 }
 0x398   :  { %2637 = vpow2.f32 %v296_v8  ;;  %v460_v10 = vsub.f32 %v453_v48, %v459_v9 }
 0x39a   :  { %v461_v11 = vmul.f32 1.442695, %v460_v10 }
 0x39b   :  { %v624_v12 = vpop.xlane.xlu0 %623 }
 0x39c   :  { %2639 = vpow2.f32 %v461_v11  ;;  %v625_v13 = vsub.f32 %v618_v51, %v624_v12 }
 0x39e   :  { %v626_v14 = vmul.f32 1.442695, %v625_v13 }
 0x39f   :  { %v789_v18 = vpop.xlane.xlu0 %788 }
 0x3a0   :  { %2641 = vpow2.f32 %v626_v14  ;;  %v790_v19 = vsub.f32 %v783_v54, %v789_v18 }
 0x3a2   :  { %v2638_v20 = vpop.eup %2637  ;;  %v791_v24 = vmul.f32 1.442695, %v790_v19 }
 0x3a3   :  { %v298_v25 = vsel %vm217_vm2, %v2638_v20, 0.0  ;;  %v970_v33 = vpop.xlane.xlu1 %969 }
 0x3a4   :  { %2643 = vpow2.f32 %v791_v24  ;;  %299 = vadd.xlane.f32.xlu1 %v298_v25  ;;  %v971_v34 = vsub.f32 %v964_v57, %v970_v33  ;;  %v35_v33 = vld [vmem:[%s3161_s1 + $0x28] sm:$0xff] }
 0x3a6   :  { %v2640_v26 = vpop.eup %2639  ;;  %v972_v38 = vmul.f32 1.442695, %v971_v34 }
 0x3a7   :  { %v463_v27 = vsel %vm217_vm2, %v2640_v26, 0.0  ;;  %v1135_v35 = vpop.xlane.xlu0 %1134 }
 0x3a8   :  { %464 = vadd.xlane.f32.xlu0 %v463_v27  ;;  %v1136_v37 = vsub.f32 %v1129_v60, %v1135_v35  ;;  %2645 = vpow2.f32 %v972_v38  ;;  %v36_v35 = vld [vmem:[%s3161_s1 + $0x30] sm:$0xff] }
 0x3aa   :  { %v2642_v28 = vpop.eup %2641  ;;  %v1137_v41 = vmul.f32 1.442695, %v1136_v37 }
 0x3ab   :  { %v628_v30 = vsel %vm217_vm2, %v2642_v28, 0.0  ;;  %v1300_v36 = vpop.xlane.xlu1 %1299 }
 0x3ac   :  { %629 = vadd.xlane.f32.xlu1 %v628_v30  ;;  %v1301_v39 = vsub.f32 %v1294_v63, %v1300_v36  ;;  %2647 = vpow2.f32 %v1137_v41  ;;  %v37_v36 = vld [vmem:[%s3161_s1 + $0x38] sm:$0xff] }
 0x3ad   :  { %v2570_v37 = vpack.c.bf16 %v37_v36, %v36_v35  ;;  %v1685_v36 = vsub.s32 2, %v2793_v15 }
 0x3ae   :  { %v2899_v31 = vpop.eup %2643  ;;  %v1302_v42 = vmul.f32 1.442695, %v1301_v39 }
 0x3af   :  { %v793_v32 = vsel %vm217_vm2, %v2899_v31, 0.0  ;;  %v1465_v40 = vpop.xlane.xlu0 %1464  ;;  %v799_v53 = vpop.permute.xlu1 %798 }
 0x3b0   :  { %794 = vadd.xlane.f32.xlu0 %v793_v32  ;;  %v1466_v43 = vsub.f32 %v1459_v2, %v1465_v40  ;;  %2649 = vpow2.f32 %v1302_v42 }
 0x3b2   :  { %v1467_v44 = vmul.f32 1.442695, %v1466_v43  ;;  %v2646_v45 = vpop.eup %2645 }
 0x3b3   :  { %v974_v47 = vsel %vm217_vm2, %v2646_v45, 0.0  ;;  %v634_v54 = vpop.permute.xlu0 %633 }
 0x3b4   :  { %2651 = vpow2.f32 %v1467_v44 }
 0x3b6   :  { %v2907_v46 = vpop.eup %2647 }
 0x3b7   :  { %v1139_v50 = vsel %vm217_vm2, %v2907_v46, 0.0 }
 0x3ba   :  { %v2910_v48 = vpop.eup %2649 }
 0x3bb   :  { %v1304_v49 = vsel %vm217_vm2, %v2910_v48, 0.0 }
 0x3bd   :  { %1144 = vrot.lane.b32.xlu1 %v2828_v29, %s2711_s28 }
 0x3be   :  { %v2916_v51 = vpop.eup %2651 }
 0x3bf   :  { %v1469_v52 = vsel %vm217_vm2, %v2916_v51, 0.0 }
 0x3c6   :  { %979 = vrot.lane.b32.xlu0 %v2828_v29, %s2712_s29 }
 0x3e1   :  { %975 = vadd.xlane.f32.xlu1 %v974_v47 }
 0x3e5   :  { %1305 = vadd.xlane.f32.xlu1 %v1304_v49  ;;  %1140 = vadd.xlane.f32.xlu0 %v1139_v50 }
 0x3e9   :  { %1470 = vadd.xlane.f32.xlu1 %v1469_v52 }
 0x3fa   :  { %1474 = vrot.lane.b32.xlu1 %v2828_v29, %s2713_s30 }
 0x3fb   :  { %1309 = vrot.lane.b32.xlu0 %v2828_v29, %s2714_s8 }
 0x431   :  { %v300_v55 = vpop.xlane.xlu1 %299 }
 0x432   :  { %2653 = vrcp.f32 %v300_v55 }
 0x435   :  { %v465_v56 = vpop.xlane.xlu0 %464 }
 0x436   :  { %2655 = vrcp.f32 %v465_v56 }
 0x439   :  { %v630_v57 = vpop.xlane.xlu1 %629 }
 0x43a   :  { %2657 = vrcp.f32 %v630_v57 }
 0x43c   :  { %v2654_v58 = vpop.eup %2653 }
 0x43d   :  { %v302_v59 = vmul.f32 %v2654_v58, %v2638_v20  ;;  %v795_v60 = vpop.xlane.xlu0 %794  ;;  %v1145_v3 = vpop.permute.xlu1 %1144  ;;  %v1567_v58 = vsub.s32 1, %v2793_v15 }
 0x43e   :  { %2659 = vrcp.f32 %v795_v60 }
 0x43f   :  { %2467 = vmatmul.mubr.msk.f32.vlgmr.msra.gmra.mrb[4].mxu1 %vm217_vm2, %v302_v59  ;;  %v1568_v59 = vrot.slane %v2799_v17, %v1567_v58 }
 0x440   :  { %v2656_v61 = vpop.eup %2655  ;;  %2475 = vmatpush3.msra.mxu1 %v2894_v5  ;;  %2476 = vmatprep.mubr.msk.f32.mxu1 %vm2703_vm1, %v2702_v23 }
 0x441   :  { %v467_v29 = vmul.f32 %v2656_v61, %v2640_v26  ;;  %2484 = vmatprep.subr.mxu1 %v2702_v23  ;;  %v980_v2 = vpop.permute.xlu0 %979 }
 0x443   :  { %2477 = vmatmul.mubr.msk.f32.vlgmr.msra.gmra.mrb[6].mxu1 %vm217_vm2, %v467_v29 }
 0x444   :  { %v2658_v62 = vpop.eup %2657  ;;  %2485 = vmatpush3.msra.mxu1 %v634_v54  ;;  %2486 = vmatprep.mubr.msk.f32.mxu1 %vm2703_vm1, %v2702_v23 }
 0x445   :  { %v632_v63 = vmul.f32 %v2658_v62, %v2642_v28  ;;  %2494 = vmatprep.subr.mxu1 %v2702_v23 }
 0x447   :  { %2487 = vmatmul.mubr.msk.f32.vlgmr.msra.gmra.mrb[8].mxu1 %vm217_vm2, %v632_v63 }
 0x448   :  { %v2660_v0 = vpop.eup %2659  ;;  %2495 = vmatpush3.msra.mxu1 %v799_v53  ;;  %2496 = vmatprep.mubr.msk.f32.mxu1 %vm2703_vm1, %v2702_v23 }
 0x449   :  { %v797_v1 = vmul.f32 %v2660_v0, %v2899_v31  ;;  %2504 = vmatprep.subr.mxu1 %v2702_v23 }
 0x44b   :  { %2497 = vmatmul.mubr.msk.f32.vlgmr.msra.gmra.mrb[10].mxu1 %vm217_vm2, %v797_v1 }
 0x44c   :  { %2505 = vmatpush3.msra.mxu1 %v980_v2  ;;  %2506 = vmatprep.mubr.msk.f32.mxu1 %vm2703_vm1, %v2702_v23 }
 0x44d   :  { %2514 = vmatprep.subr.mxu1 %v2702_v23 }
 0x46e   :  { %v976_v4 = vpop.xlane.xlu1 %975 }
 0x46f   :  { %2661 = vrcp.f32 %v976_v4 }
 0x472   :  { %v1306_v5 = vpop.xlane.xlu1 %1305  ;;  %v1141_v6 = vpop.xlane.xlu0 %1140 }
 0x473   :  { %2663 = vrcp.f32 %v1141_v6 }
 0x474   :  { %2665 = vrcp.f32 %v1306_v5 }
 0x476   :  { %v1471_v7 = vpop.xlane.xlu1 %1470  ;;  %v1310_v13 = vpop.permute.xlu0 %1309 }
 0x477   :  { %2667 = vrcp.f32 %v1471_v7  ;;  %v2593_v7 = vld [vmem:[%s3165_s5] ss:$16 sps:$4 sm:$0xff]  }
 0x479   :  { %v2662_v8 = vpop.eup %2661 }
 0x47a   :  { %v978_v9 = vmul.f32 %v2662_v8, %v2646_v45  ;;  %v1475_v19 = vpop.permute.xlu1 %1474  ;;  %v2596_v8 = vld [vmem:[%s3165_s5 + $0x8] ss:$16 sps:$4 sm:$0xff]  }
 0x47c   :  { %2507 = vmatmul.mubr.msk.f32.vlgmr.msra.gmra.mrb[12].mxu1 %vm217_vm2, %v978_v9  ;;  %v2601_v9 = vld [vmem:[%s3165_s5 + $0x24] ss:$16 sps:$4 sm:$0xff]  }
 0x47d   :  { %2515 = vmatpush3.msra.mxu1 %v1145_v3  ;;  %2516 = vmatprep.mubr.msk.f32.mxu1 %vm2703_vm1, %v2702_v23  ;;  %v2664_v10 = vpop.eup %2663 }
 0x47e   :  { %2524 = vmatprep.subr.mxu1 %v2702_v23  ;;  %v1143_v11 = vmul.f32 %v2664_v10, %v2907_v46  ;;  %v2666_v12 = vpop.eup %2665  ;;  %v2604_v10 = vld [vmem:[%s3165_s5 + $0x2c] ss:$16 sps:$4 sm:$0xff]  }
 0x47f   :  { %v1308_v14 = vmul.f32 %v2666_v12, %v2910_v48  ;;  %v2602_v12 = vld [vmem:[%s3165_s5 + $0x28] ss:$16 sps:$4 sm:$0xff]  }
 0x480   :  { %2517 = vmatmul.mubr.msk.f32.vlgmr.msra.gmra.mrb[14].mxu1 %vm217_vm2, %v1143_v11  ;;  %v2599_v11 = vld [vmem:[%s3165_s5 + $0x20] ss:$16 sps:$4 sm:$0xff]  }
 0x481   :  { %2525 = vmatpush3.msra.mxu1 %v1310_v13  ;;  %2526 = vmatprep.mubr.msk.f32.mxu1 %vm2703_vm1, %v2702_v23  ;;  %v2668_v18 = vpop.eup %2667  ;;  %v2718_v13 = vmov 0  }
 0x482   :  { %2534 = vmatprep.subr.mxu1 %v2702_v23  ;;  %v1473_v20 = vmul.f32 %v2668_v18, %v2916_v51  ;;  %v2606_v18 = vld [vmem:[%s3166_s6 + $0xc0] sm:$0xff]  }
 0x484   :  { %2527 = vmatmul.mubr.msk.f32.vlgmr.msra.gmra.mrb[16].mxu1 %vm217_vm2, %v1308_v14  ;;  %v2605_v14 = vld [vmem:[%s3166_s6 + $0x40] sm:$0xff]  }
 0x485   :  { %2535 = vmatpush3.msra.mxu1 %v1475_v19  ;;  %2536 = vmatprep.mubr.msk.f32.mxu1 %vm2703_vm1, %v2702_v23  ;;  %v34_v23 = vld [vmem:[%s3161_s1 + $0x20] sm:$0xff] }
 0x486   :  { %v2566_v34 = vpack.c.bf16 %v35_v33, %v34_v23 }
 0x488   :  { %2537 = vmatmul.mubr.msk.f32.vlgmr.msra.gmra.mrb[18].mxu1 %vm217_vm2, %v1473_v20  ;;  %2567 = vmatprep.subr.bf16.mxu0 %v2566_v34 }
 0x489   :  { %2569 = vmatpush3.bf16.msra.mxu0 %v2566_v34  ;;  %1801 = vmatprep.mubr.bf16.mxu1 %v2718_v13 }
 0x48a   :  { %2571 = vmatprep.subr.bf16.mxu0 %v2570_v37 }
 0x48d   :  { %2573 = vmatpush3.bf16.msra.mxu0 %v2570_v37 }
 0x512   :  { %v375_v24 = vpop.f32.mrb[4].mxu1 }
 0x513   :  { %v2468_v25 = vpop.f32.mrb[5].mxu1 }
 0x516   :  { %v540_v26 = vpop.f32.mrb[6].mxu1 }
 0x517   :  { %875 = vrot.lane.b32.xlu0 %v540_v26, %s2715_s9  ;;  %v2478_v27 = vpop.f32.mrb[7].mxu1 }
 0x51a   :  { %v705_v28 = vpop.f32.mrb[8].mxu1 }
 0x51b   :  { %879 = vrot.lane.b32.xlu1 %v705_v28, %s2716_s10  ;;  %v2488_v30 = vpop.f32.mrb[9].mxu1 }
 0x51e   :  { %v870_v31 = vpop.f32.mrb[10].mxu1 }
 0x51f   :  { %883 = vrot.lane.b32.xlu1 %v870_v31, %s2717_s11  ;;  %v2498_v32 = vpop.f32.mrb[11].mxu1 }
 0x54f   :  { %v1051_v38 = vpop.f32.mrb[12].mxu1 }
 0x550   :  { %v2508_v39 = vpop.f32.mrb[13].mxu1 }
 0x553   :  { %v1216_v40 = vpop.f32.mrb[14].mxu1 }
 0x554   :  { %1551 = vrot.lane.b32.xlu0 %v1216_v40, %s2715_s9  ;;  %v2518_v41 = vpop.f32.mrb[15].mxu1  ;;  %v1686_v40 = vrot.slane %v2799_v17, %v1685_v36 }
 0x555   :  { %v1691_v41 = vsub.s32 3, %v2793_v15 }
 0x557   :  { %v1381_v42 = vpop.f32.mrb[16].mxu1 }
 0x558   :  { %1555 = vrot.lane.b32.xlu0 %v1381_v42, %s2716_s10  ;;  %v2528_v43 = vpop.f32.mrb[17].mxu1 }
 0x55b   :  { %v1546_v44 = vpop.f32.mrb[18].mxu1 }
 0x55c   :  { %1559 = vrot.lane.b32.xlu1 %v1546_v44, %s2717_s11  ;;  %v2538_v45 = vpop.f32.mrb[19].mxu1 }
 0x589   :  { %v876_v46 = vpop.permute.xlu0 %875 }
 0x58a   :  { %v886_v48 = vsel %vm217_vm2, %v375_v24, %v876_v46  ;;  %v1692_v46 = vrot.slane %v2799_v17, %v1691_v41 }
 0x58d   :  { %v880_v47 = vpop.permute.xlu1 %879 }
 0x58e   :  { %v888_v49 = vsel %vm887_vm3, %v886_v48, %v880_v47 }
 0x591   :  { %v884_v50 = vpop.permute.xlu1 %883 }
 0x592   :  { %v890_v51 = vsel %vm889_vm4, %v888_v49, %v884_v50  ;;  %v2607_v50 = vld [vmem:[%s3166_s6] sm:$0xff]  }
 0x593   :  { %2547 = vmatprep.mubr.msk.f32.mxu0 %vm43_vm0, %v890_v51  ;;  %v2608_v51 = vld [vmem:[%s3166_s6 + $0x80] sm:$0xff]  }
 0x5c6   :  { %v1552_v52 = vpop.permute.xlu0 %1551 }
 0x5c7   :  { %v1562_v54 = vsel %vm217_vm2, %v1051_v38, %v1552_v52 }
 0x5ca   :  { %v1556_v53 = vpop.permute.xlu0 %1555 }
 0x5cb   :  { %v1563_v55 = vsel %vm887_vm3, %v1562_v54, %v1556_v53  ;;  %v2609_v53 = vld [vmem:[%s3166_s6 + $0x48] sm:$0xff]  }
 0x5cc   :  { %v2610_v54 = vld [vmem:[%s3166_s6 + $0xc8] sm:$0xff]  }
 0x5ce   :  { %v1560_v56 = vpop.permute.xlu1 %1559 }
 0x5cf   :  { %v1564_v57 = vsel %vm889_vm4, %v1563_v55, %v1560_v56  ;;  %v2611_v55 = vld [vmem:[%s3166_s6 + $0x8] sm:$0xff]  }
 0x5d0   :  { %2548 = vmatmul.mubr.msk.f32.vlgmr.msra.gmra.mrb[16].mxu0 %vm43_vm0, %v1564_v57  ;;  %v2612_v56 = vld [vmem:[%s3166_s6 + $0x88] sm:$0xff]   ;;  %v2613_v57 = vld [vmem:[%s3166_s6 + $0x50] sm:$0xff]  }
 0x5d1   :  { %1844 = vmatprep.mubr.bf16.mxu0 %v2718_v13  ;;  %v2635_v13 = vld [vmem:[%s3166_s6 + $0x38] sm:$0xff]  }
 0x6a3   :  { %v2549_v60 = vpop.f32.mrb[16].mxu0 }
 0x6a4   :  { %v1647_v61 = vadd.f32 %v2549_v60, %v1568_v59  ;;  %v1641_v29 = vpop.f32.mrb[17].mxu0  ;;  %v2615_v60 = vld [vmem:[%s3166_s6 + $0x10] sm:$0xff]  }
 0x6a5   :  { %v1642_v62 = vadd.f32 %v1641_v29, %v1568_v59  ;;  %v2614_v59 = vld [vmem:[%s3166_s6 + $0xd0] sm:$0xff]   ;;  %v2617_v29 = vld [vmem:[%s3166_s6 + $0x58] sm:$0xff]  }
 0x6a6   :  { %v1651_v63 = vadd.f32 %v1647_v61, %v2806_v22  ;;  %v2595_v22 = vld [vmem:[%s3165_s5 + $0x4] ss:$16 sps:$4 sm:$0xff]  }
 0x6a7   :  { %v1650_v0 = vadd.f32 %v1642_v62, %v2804_v21  ;;  %v2598_v21 = vld [vmem:[%s3165_s5 + $0xc] ss:$16 sps:$4 sm:$0xff]   ;;  %1769 = vmatprep.subr.bf16.mxu1 %v2595_v22  ;;  %v2616_v61 = vld [vmem:[%s3166_s6 + $0x90] sm:$0xff]  }
 0x6a8   :  { %v1655_v1 = vsel %vm43_vm0, %v1651_v63, 0.0  ;;  %v1662_v5 = vmul.f32 %v1651_v63, %v1651_v63  ;;  %1812 = vmatprep.subr.bf16.mxu0 %v2598_v21  ;;  %1770 = vmatpush1.bf16.msra.mxu1 %v2593_v7  ;;  %v2618_v62 = vld [vmem:[%s3166_s6 + $0xd8] sm:$0xff]   ;;  %v2627_v22 = vld [vmem:[%s3166_s6 + $0x28] sm:$0xff]   ;;  %v2629_v7 = vld [vmem:[%s3166_s6 + $0x70] sm:$0xff]  }
 0x6a9   :  { %1656 = vadd.xlane.f32.xlu1 %v1655_v1  ;;  %v1652_v2 = vsel %vm43_vm0, %v1650_v0, 0.0  ;;  %v1661_v3 = vmul.f32 %v1650_v0, %v1650_v0  ;;  %1813 = vmatpush1.bf16.msra.mxu0 %v2596_v8  ;;  %v2621_v1 = vld [vmem:[%s3166_s6 + $0x60] sm:$0xff]   ;;  %v2628_v21 = vld [vmem:[%s3166_s6 + $0xa8] sm:$0xff]   ;;  %v2630_v8 = vld [vmem:[%s3166_s6 + $0xf0] sm:$0xff]  }
 0x6aa   :  { %1653 = vadd.xlane.f32.xlu0 %v1652_v2  ;;  %v1666_v6 = vsel %vm43_vm0, %v1662_v5, 0.0  ;;  %1771 = vmatprep.subr.bf16.mxu1 %v2601_v9  ;;  %v2622_v2 = vld [vmem:[%s3166_s6 + $0xe0] sm:$0xff]   ;;  %v2625_v5 = vld [vmem:[%s3166_s6 + $0x68] sm:$0xff]   ;;  %v2631_v9 = vld [vmem:[%s3166_s6 + $0x30] sm:$0xff]  }
 0x6ab   :  { %v1663_v4 = vsel %vm43_vm0, %v1661_v3, 0.0  ;;  %1814 = vmatprep.subr.bf16.mxu0 %v2604_v10  ;;  %v2623_v3 = vld [vmem:[%s3166_s6 + $0x20] sm:$0xff]   ;;  %v2632_v10 = vld [vmem:[%s3166_s6 + $0xb0] sm:$0xff]  }
 0x6ac   :  { %1772 = vmatpush1.bf16.msra.mxu1 %v2599_v11  ;;  %v2633_v11 = vld [vmem:[%s3166_s6 + $0x78] sm:$0xff]  }
 0x6ad   :  { %1815 = vmatpush1.bf16.msra.mxu0 %v2602_v12  ;;  %2393 = vmatprep.subr.bf16.mxu1 %v2605_v14  ;;  %v2634_v12 = vld [vmem:[%s3166_s6 + $0xf8] sm:$0xff]  }
 0x6ae   :  { %1664 = vadd.xlane.f32.xlu0 %v1663_v4  ;;  %2415 = vmatprep.subr.bf16.mxu0 %v2606_v18  ;;  %v2624_v4 = vld [vmem:[%s3166_s6 + $0xa0] sm:$0xff]   ;;  %v2636_v14 = vld [vmem:[%s3166_s6 + $0xb8] sm:$0xff]  }
 0x6af   :  { %v1704_v18 = vld [vmem:[%s3164_s4] sm:$0xf] }
 0x6b2   :  { %1667 = vadd.xlane.f32.xlu0 %v1666_v6  ;;  %v2626_v6 = vld [vmem:[%s3166_s6 + $0xe8] sm:$0xff]  }
 0x736   :  { %v1657_v24 = vpop.xlane.xlu1 %1656 }
 0x737   :  { %v1654_v19 = vpop.xlane.xlu0 %1653  ;;  %v1660_v26 = vmul.f32 0.03125, %v1657_v24  ;;  %v1713_v24 = vrot.slane %v1704_v18, %v1567_v58 }
 0x738   :  { %v1659_v20 = vmul.f32 0.03125, %v1654_v19  ;;  %v1709_v19 = vrot.slane %v1704_v18, %v41_v16 }
 0x739   :  { %v1672_v32 = vmul.f32 %v1660_v26, %v1660_v26  ;;  %v1676_v42 = vsub.f32 %v1651_v63, %v1660_v26  ;;  %v2619_v63 = vld [vmem:[%s3166_s6 + $0x18] sm:$0xff]  }
 0x73a   :  { %v1671_v27 = vmul.f32 %v1659_v20, %v1659_v20  ;;  %v1675_v37 = vsub.f32 %v1650_v0, %v1659_v20  ;;  %v2620_v0 = vld [vmem:[%s3166_s6 + $0x98] sm:$0xff]   ;;  %v1717_v20 = vrot.slane %v1704_v18, %v1685_v36 }
 0x73b   :  { %v1665_v25 = vpop.xlane.xlu0 %1664 }
 0x73c   :  { %v1669_v28 = vmul.f32 0.03125, %v1665_v25  ;;  %v1721_v25 = vrot.slane %v1704_v18, %v1691_v41 }
 0x73e   :  { %v1673_v30 = vsub.f32 %v1669_v28, %v1671_v27 }
 0x73f   :  { %v1668_v31 = vpop.xlane.xlu0 %1667 }
 0x740   :  { %v1677_v23 = vadd.f32 1e-05, %v1673_v30  ;;  %v1670_v33 = vmul.f32 0.03125, %v1668_v31 }
 0x742   :  { %2669 = vrsqrt.f32 %v1677_v23  ;;  %v1674_v34 = vsub.f32 %v1670_v33, %v1672_v32 }
 0x744   :  { %v1678_v35 = vadd.f32 1e-05, %v1674_v34 }
 0x746   :  { %2671 = vrsqrt.f32 %v1678_v35 }
 0x74c   :  { %v2670_v38 = vpop.eup %2669 }
 0x74d   :  { %v1681_v39 = vmul.f32 %v2670_v38, %v1675_v37 }
 0x74f   :  { %v1687_v45 = vmul.f32 %v1686_v40, %v1681_v39 }
 0x750   :  { %v2672_v43 = vpop.eup %2671 }
 0x751   :  { %v1682_v44 = vmul.f32 %v2672_v43, %v1676_v42  ;;  %v3023_v48 = vadd.f32 %v1692_v46, %v1687_v45 }
 0x753   :  { %v1688_v47 = vmul.f32 %v1686_v40, %v1682_v44 }
 0x755   :  { %v3025_v49 = vadd.f32 %v1692_v46, %v1688_v47 }
 0x757   :  { %v1695_v52 = vpack.c.bf16 %v3025_v49, %v3023_v48 }
 0x759   :  { %2309 = vmatmul.mubr.msk.bf16.vlgmr.msra.gmra.mrb[20].mxu1 %vm43_vm0, %v1695_v52  ;;  %2310 = vmatmul.mubr.msk.bf16.vlgmr.msra.gmra.mrb[20].mxu0 %vm43_vm0, %v1695_v52 }
 0x75a   :  { %2394 = vmatpush3.bf16.msra.mxu1 %v2607_v50  ;;  %2416 = vmatpush3.bf16.msra.mxu0 %v2608_v51 }
 0x75b   :  { %2395 = vmatprep.subr.bf16.mxu1 %v2609_v53  ;;  %2417 = vmatprep.subr.bf16.mxu0 %v2610_v54  ;;  %v1933_v54 = vsub.s32 4, %v2793_v15 }
 0x75e   :  { %2396 = vmatpush3.bf16.msra.mxu1 %v2611_v55  ;;  %2418 = vmatpush3.bf16.msra.mxu0 %v2612_v56 }
 0x75f   :  { %2397 = vmatprep.subr.bf16.mxu1 %v2613_v57  ;;  %2419 = vmatprep.subr.bf16.mxu0 %v2614_v59  ;;  %v1934_v57 = vrot.slane %v2799_v17, %v1933_v54 }
 0x762   :  { %2398 = vmatpush3.bf16.msra.mxu1 %v2615_v60  ;;  %2420 = vmatpush3.bf16.msra.mxu0 %v2616_v61 }
 0x763   :  { %2399 = vmatprep.subr.bf16.mxu1 %v2617_v29  ;;  %2421 = vmatprep.subr.bf16.mxu0 %v2618_v62 }
 0x766   :  { %2400 = vmatpush3.bf16.msra.mxu1 %v2619_v63  ;;  %2422 = vmatpush3.bf16.msra.mxu0 %v2620_v0 }
 0x767   :  { %2401 = vmatprep.subr.bf16.mxu1 %v2621_v1  ;;  %2423 = vmatprep.subr.bf16.mxu0 %v2622_v2 }
 0x76a   :  { %2402 = vmatpush3.bf16.msra.mxu1 %v2623_v3  ;;  %2424 = vmatpush3.bf16.msra.mxu0 %v2624_v4 }
 0x76b   :  { %2403 = vmatprep.subr.bf16.mxu1 %v2625_v5  ;;  %2425 = vmatprep.subr.bf16.mxu0 %v2626_v6 }
 0x76e   :  { %2404 = vmatpush3.bf16.msra.mxu1 %v2627_v22  ;;  %2426 = vmatpush3.bf16.msra.mxu0 %v2628_v21 }
 0x76f   :  { %2405 = vmatprep.subr.bf16.mxu1 %v2629_v7  ;;  %2427 = vmatprep.subr.bf16.mxu0 %v2630_v8 }
 0x772   :  { %2406 = vmatpush3.bf16.msra.mxu1 %v2631_v9  ;;  %2428 = vmatpush3.bf16.msra.mxu0 %v2632_v10 }
 0x773   :  { %2407 = vmatprep.subr.bf16.mxu1 %v2633_v11  ;;  %2429 = vmatprep.subr.bf16.mxu0 %v2634_v12 }
 0x776   :  { %2408 = vmatpush3.bf16.msra.mxu1 %v2635_v13  ;;  %2430 = vmatpush3.bf16.msra.mxu0 %v2636_v14 }
 0x82c   :  { %v1803_v26 = vpop.f32.mrb[20].mxu1  ;;  %v1846_v27 = vpop.f32.mrb[20].mxu0 }
 0x82d   :  { %v1804_v28 = vadd.f32 %v1803_v26, %v1709_v19  ;;  %v1847_v30 = vadd.f32 %v1846_v27, %v1717_v20  ;;  %v1805_v31 = vpop.f32.mrb[21].mxu1  ;;  %v1848_v32 = vpop.f32.mrb[21].mxu0 }
 0x82e   :  { %v1806_v23 = vadd.f32 %v1805_v31, %v1713_v24  ;;  %v1849_v33 = vadd.f32 %v1848_v32, %v1721_v25  ;;  %v1807_v34 = vpop.f32.mrb[22].mxu1  ;;  %v1850_v35 = vpop.f32.mrb[22].mxu0  ;;  %v2243_v32 = vsub.s32 5, %v2793_v15 }
 0x82f   :  { %v1808_v16 = vadd.f32 %v1807_v34, %v1709_v19  ;;  %v1851_v37 = vadd.f32 %v1850_v35, %v1717_v20  ;;  %v1809_v38 = vpop.f32.mrb[23].mxu1  ;;  %v1852_v36 = vpop.f32.mrb[23].mxu0  ;;  %v1855_v58 = vmax.f32 %v1804_v28, 0.0  ;;  %v1857_v42 = vmax.f32 %v1847_v30, 0.0  ;;  %v2677_v34 = vld [vmem:[%s3163_s3] sm:$0xff] }
 0x830   :  { %v1810_v39 = vadd.f32 %v1809_v38, %v1713_v24  ;;  %v1853_v40 = vadd.f32 %v1852_v36, %v1721_v25  ;;  %v1856_v44 = vmax.f32 %v1806_v23, 0.0  ;;  %v1858_v45 = vmax.f32 %v1849_v33, 0.0 }
 0x831   :  { %v1859_v43 = vmax.f32 %v1808_v16, 0.0  ;;  %v1861_v41 = vmax.f32 %v1851_v37, 0.0  ;;  %v2249_v23 = vsub.s32 6, %v2793_v15  ;;  %v2244_v35 = vrot.slane %v2677_v34, %v2243_v32 }
 0x832   :  { %v1860_v46 = vmax.f32 %v1810_v39, 0.0  ;;  %v1862_v47 = vmax.f32 %v1853_v40, 0.0 }
 0x833   :  { %v1863_v50 = vpack.c.bf16 %v1859_v43, %v1855_v58  ;;  %v1865_v51 = vpack.c.bf16 %v1861_v41, %v1857_v42  ;;  %v2250_v36 = vrot.slane %v2677_v34, %v2249_v23 }
 0x834   :  { %v1864_v52 = vpack.c.bf16 %v1860_v46, %v1856_v44  ;;  %v1866_v53 = vpack.c.bf16 %v1862_v47, %v1858_v45 }
 0x836   :  { %2159 = vmatprep.mubr.bf16.mxu1 %v1864_v52  ;;  %2200 = vmatprep.mubr.bf16.mxu0 %v1866_v53 }
 0x837   :  { %2160 = vmatmul.mubr.bf16.vlgmr.msra.gmra.mrb[24].mxu1 %v1863_v50  ;;  %2201 = vmatmul.mubr.bf16.vlgmr.msra.gmra.mrb[24].mxu0 %v1865_v51 }
 0x90a   :  { %v2409_v55 = vpop.f32.mrb[24].mxu1  ;;  %v2431_v56 = vpop.f32.mrb[24].mxu0 }
 0x90b   :  { %v2410_v59 = vpop.f32.mrb[25].mxu1  ;;  %v2432_v60 = vpop.f32.mrb[25].mxu0 }
 0x90c   :  { %v2411_v61 = vadd.f32 %v2410_v59, %v2409_v55  ;;  %v2433_v29 = vadd.f32 %v2432_v60, %v2431_v56  ;;  %v2412_v62 = vpop.f32.mrb[26].mxu1  ;;  %v2434_v63 = vpop.f32.mrb[26].mxu0 }
 0x90d   :  { %v2413_v0 = vpop.f32.mrb[27].mxu1  ;;  %v2435_v1 = vpop.f32.mrb[27].mxu0 }
 0x90e   :  { %v2162_v2 = vadd.f32 %v2411_v61, %v1934_v57  ;;  %v2414_v3 = vadd.f32 %v2413_v0, %v2412_v62  ;;  %v2436_v4 = vadd.f32 %v2435_v1, %v2434_v63 }
 0x910   :  { %v2203_v5 = vadd.f32 %v2433_v29, %v2162_v2  ;;  %v2165_v6 = vadd.f32 %v2414_v3, %v1934_v57 }
 0x912   :  { %v2209_v22 = vadd.f32 %v2203_v5, %v3023_v48  ;;  %v2206_v21 = vadd.f32 %v2436_v4, %v2165_v6 }
 0x914   :  { %v2210_v7 = vadd.f32 %v2206_v21, %v3025_v49  ;;  %v2211_v17 = vsel %vm43_vm0, %v2209_v22, 0.0  ;;  %v2219_v8 = vmul.f32 %v2209_v22, %v2209_v22 }
 0x915   :  { %2212 = vadd.xlane.f32.xlu1 %v2211_v17 }
 0x916   :  { %v2214_v9 = vsel %vm43_vm0, %v2210_v7, 0.0  ;;  %v2220_v10 = vmul.f32 %v2210_v7, %v2210_v7  ;;  %v2221_v11 = vsel %vm43_vm0, %v2219_v8, 0.0 }
 0x917   :  { %2215 = vadd.xlane.f32.xlu0 %v2214_v9 }
 0x918   :  { %v2224_v12 = vsel %vm43_vm0, %v2220_v10, 0.0 }
 0x919   :  { %2222 = vadd.xlane.f32.xlu1 %v2221_v11 }
 0x91b   :  { %2225 = vadd.xlane.f32.xlu0 %v2224_v12 }
 0x9a2   :  { %v2213_v13 = vpop.xlane.xlu1 %2212 }
 0x9a3   :  { %v2217_v14 = vmul.f32 0.03125, %v2213_v13 }
 0x9a4   :  { %v2216_v48 = vpop.xlane.xlu0 %2215 }
 0x9a5   :  { %v2218_v18 = vmul.f32 0.03125, %v2216_v48  ;;  %v2229_v49 = vmul.f32 %v2217_v14, %v2217_v14  ;;  %v2233_v33 = vsub.f32 %v2209_v22, %v2217_v14 }
 0x9a6   :  { %v2223_v19 = vpop.xlane.xlu1 %2222 }
 0x9a7   :  { %v2227_v20 = vmul.f32 0.03125, %v2223_v19  ;;  %v2230_v25 = vmul.f32 %v2218_v18, %v2218_v18  ;;  %v2234_v37 = vsub.f32 %v2210_v7, %v2218_v18 }
 0x9a8   :  { %v2226_v24 = vpop.xlane.xlu0 %2225 }
 0x9a9   :  { %v2231_v26 = vsub.f32 %v2227_v20, %v2229_v49  ;;  %v2228_v27 = vmul.f32 0.03125, %v2226_v24 }
 0x9ab   :  { %v2235_v28 = vadd.f32 1e-05, %v2231_v26  ;;  %v2232_v30 = vsub.f32 %v2228_v27, %v2230_v25 }
 0x9ad   :  { %2673 = vrsqrt.f32 %v2235_v28  ;;  %v2236_v31 = vadd.f32 1e-05, %v2232_v30 }
 0x9af   :  { %2675 = vrsqrt.f32 %v2236_v31 }
 0x9b7   :  { %v2674_v16 = vpop.eup %2673 }
 0x9b8   :  { %v2239_v38 = vmul.f32 %v2674_v16, %v2233_v33 }
 0x9b9   :  { %v2676_v39 = vpop.eup %2675 }
 0x9ba   :  { %v2240_v40 = vmul.f32 %v2676_v39, %v2234_v37  ;;  %v2245_v58 = vmul.f32 %v2244_v35, %v2239_v38 }
 0x9bc   :  { %v2246_v42 = vmul.f32 %v2244_v35, %v2240_v40  ;;  %v2251_v43 = vadd.f32 %v2250_v36, %v2245_v58 }
 0x9be   :  { %v2252_v41 = vadd.f32 %v2250_v36, %v2246_v42  ;;  %2253 = vst.msk [vmem:[#allocation2] sm:$0xff] %vm43_vm0, %v2251_v43 }
 0x9c0   :  { %2254 = vst.msk [vmem:[#allocation2 + $0x8] sm:$0xff] %vm43_vm0, %v2252_v41 }
 0x9c1   :  { %2689 = shalt.err (!%p2686_p4)
}
 0x9c2   :  { %s2690_s25 = scalar_lea.hbm %s3167_s7, 256 }
 0x9c3   :  { %p2691_p5 = scmp.ne.s32.totalorder %s3167_s7, %s2690_s25  ;;  %p2694_p6 = scmp.lt.u32.totalorder %s2690_s25, %s3167_s7 }
 0x9c5   :  { %p2696_p7 = pnand %p2694_p6, %p2691_p5 }
 0x9c7   :  { %2699 = shalt.err (!%p2696_p7)
}
 0x9c8   :  { %s2720_s30 = smov 128  }
 0x9c9   :  { %2266 = dma.vmem_to_hbm [thread:$0]  %s2261_s22, 256, %s3167_s7, [#allocation3], %s2720_s30, %s2720_s30, %s2715_s9  }
 0x9ca   :  { %2700 = dma.done.wait [#allocation3], 256  }
 0x9cb   :  { %2701 = vsyncadd [#allocation3], 4294967040 }
 0x9cc   :  { %2270 = vsyncpa [#allocation3], 1 }

</bundles_post_ra>
